<compile_context>
chip_gen: v7x
topology: tpu7x:2x2x1
jax: 0.10.0
libtpu: 0.0.40
codegen_flags: <defaults>
</compile_context>

<pallas_src>
import numpy as np
import jax
import jax.numpy as jnp
from jax.experimental import pallas as pl


def _identity_kernel(x_hbm_ref, o_hbm_ref):
    # Output aliases the input HBM buffer, so the data is already in place.
    # No loads, stores, scratch, or DMAs: an empty body lowers to a trivial
    # Mosaic func and the aliased output is the result.
    del x_hbm_ref, o_hbm_ref


def identity(x: jax.Array) -> jax.Array:
    """Identity forward pass: y = x with zero HBM traffic for a donated input.

    Invariant: out_shape is built from x.shape / x.dtype exactly.  Correctness
    relies on the output alias (input_output_aliases={0: 0}); if the alias or
    the exact shape/dtype match were ever broken, the output would be an
    uninitialized buffer.
    """
    out_shape = jax.ShapeDtypeStruct(x.shape, x.dtype)
    return pl.pallas_call(
        _identity_kernel,
        out_shape=out_shape,
        in_specs=[pl.BlockSpec(memory_space=pl.ANY)],   # leave in HBM, no auto-DMA
        out_specs=pl.BlockSpec(memory_space=pl.ANY),    # aliased to the input
        input_output_aliases={0: 0},
        cost_estimate=pl.CostEstimate(flops=0, transcendentals=0, bytes_accessed=0),
    )(x)


if __name__ == "__main__":
    key = jax.random.PRNGKey(0)
    x = jax.random.normal(key, (2, 4, 16, 16), dtype=jnp.float32)

    # Snapshot expected values on the host BEFORE the call: x is donated, so
    # its device buffer is consumed by the aliased output and must be dead
    # afterwards (this is what makes the zero-copy alias actually hold).
    expected = np.asarray(x)

    identity_jit = jax.jit(identity, donate_argnums=0)
    y = identity_jit(x)
    jax.block_until_ready(y)

    assert y.shape == expected.shape, (y.shape, expected.shape)
    assert y.dtype == expected.dtype, (y.dtype, expected.dtype)
    np.testing.assert_array_equal(np.asarray(y), expected)

    print("KERNEL_OK")
</pallas_src>

<mosaic_0001>
module attributes {stable_mosaic.version = 11 : i64} {
  func.func @_identity_kernel(%arg0: memref<2x4x16x16xf32, #tpu.memory_space<any>>, %arg1: memref<2x4x16x16xf32, #tpu.memory_space<any>>) attributes {dimension_semantics = [], scalar_prefetch = 0 : i64, scratch_operands = 0 : i64, tpu.core_type = #tpu.core_type<tc>} {
    return
  }
}

</mosaic_0001>

<bundles_post_ra>
// kernel: identity.1
= control target key start
LH: loop header
LB: loop body
LE: loop exit
PB: predicated region body
PF: predicated region fallthrough
CT: control target
= control target key end

     0   :  { %s16_s0 = inlined_call_operand.hbm [shape: f32[2,4,16,16], index: 0, kind: input, shape index: {}, may-alias: {0,1}]   ;;  %s17_s1 = inlined_call_operand.hbm [shape: f32[2,4,16,16], index: 1, kind: output, shape index: {}, may-alias: {0,1}]  }

</bundles_post_ra>
